<compile_context>
chip_gen: v7x
topology: tpu7x:2x2x1
jax: 0.10.0
libtpu: 0.0.40
codegen_flags: <defaults>
</compile_context>

<pallas_src>
import functools

import jax
import jax.numpy as jnp
from jax import lax
from jax.experimental import pallas as pl
from jax.experimental.pallas import tpu as pltpu


_GAP = 2  # zero lanes on each side of every packed image (covers the dilation-2 taps)

# pltpu.roll is assumed jnp.roll-compatible (positive shift -> higher indices).
# The tiny probe in __main__ resolves the hardware convention once, outside jit.
_ROLL_IS_FWD = True


def _probe_roll_convention():
    def k(x_ref, o_ref):
        o_ref[...] = pltpu.roll(x_ref[...], 1, axis=1)
    x = jnp.broadcast_to(jnp.arange(128, dtype=jnp.float32), (8, 128))
    r = pl.pallas_call(k, out_shape=jax.ShapeDtypeStruct((8, 128), jnp.float32))(x)
    return bool(r[0, 1] == 0.0)   # jnp.roll convention: result[1] = x[0] = 0


def _tree_sum(vals):
    """Pairwise (tree) sum: shortens the accumulation dependence chain."""
    vals = list(vals)
    while len(vals) > 1:
        nxt = [vals[i] + vals[i + 1] for i in range(0, len(vals) - 1, 2)]
        if len(vals) % 2:
            nxt.append(vals[-1])
        vals = nxt
    return vals[0]


def _fused_autoencoder_kernel(w_ref, b_ref, x_ref, o_ref, *,
                              cin0, H, W, PW, SW, ips,
                              layer_io, dils, w_offs, b_offs, roll_fwd):
    """Full autoencoder forward for one packed group of `ips` images.

    w_ref, b_ref : SMEM (scalar prefetch) - all conv weights / biases, flat OIHW.
    x_ref        : VMEM (1, cin0, H, PW) - `ips` images packed along lanes, each in a
                   (W + 2*_GAP)-lane slot whose gap columns are zero.
    o_ref        : VMEM (1, cin0, H, PW)
    """
    P = _GAP
    f32 = jnp.float32

    def _shift(x, s, axis):
        """Circular shift: result[i] = x[i - s].  Callers arrange for the wrapped
        content to be zero (lane gaps) or pre-masked (vertical)."""
        n = x.shape[axis]
        s = s % n
        if s == 0:
            return x
        if not roll_fwd:
            s = n - s
        return pltpu.roll(x, s, axis=axis)

    # ---- loop-invariant masks (built once; broadcast_in_dim is not CSE'd) ----
    row = lax.broadcasted_iota(jnp.int32, (H, PW), 0)
    col = lax.broadcasted_iota(jnp.int32, (H, PW), 1)
    img_mask = None                      # lanes holding real image columns
    for i in range(ips):
        lo = i * SW + P
        m = jnp.logical_and(col >= lo, col < lo + W)
        img_mask = m if img_mask is None else jnp.logical_or(img_mask, m)
    # SW and P are even, so global lane parity == image-relative column parity.
    even_mask = jnp.logical_and(
        img_mask, jnp.logical_and((row & 1) == 0, (col & 1) == 0))
    keep_ge = {d: row >= d for d in set(dils)}     # pre-mask for the ky=+1 window
    keep_lt = {d: row < H - d for d in set(dils)}  # pre-mask for the ky=-1 window

    def conv3x3_sigmoid(planes, li, mask_gaps):
        cout, cin = layer_io[li]
        d = dils[li]
        wo, bo = w_offs[li], b_offs[li]
        # Hoist all SMEM scalar loads of this layer ahead of the vector work.
        wv = [w_ref[wo + t] for t in range(cout * cin * 9)]
        bv = [b_ref[bo + c] for c in range(cout)]
        accs = [jnp.full((H, PW), bv[co], dtype=f32) for co in range(cout)]
        for ci in range(cin):
            p = planes[ci]
            # Vertical zero halo: pre-zero the rows that would wrap, then roll
            # (rolls run on the XLU; only 2 VPU selects per input channel).
            src_m1 = jnp.where(keep_lt[d], p, 0.0)   # feeds window ky = -1
            src_p1 = jnp.where(keep_ge[d], p, 0.0)   # feeds window ky = +1
            wins = []
            for src, vs in ((src_m1, d), (p, 0), (src_p1, -d)):   # ky = -1, 0, +1
                base = _shift(src, vs, axis=0)
                # Horizontal zero halo comes from the inter-image gap lanes.
                wins.append(_shift(base, d, axis=1))     # kx = -1
                wins.append(base)                        # kx =  0
                wins.append(_shift(base, -d, axis=1))    # kx = +1
            for co in range(cout):
                wbase = (co * cin + ci) * 9
                accs[co] = accs[co] + _tree_sum(
                    [wv[wbase + t] * wins[t] for t in range(9)])
        outs = []
        for co in range(cout):
            s = jax.nn.sigmoid(accs[co])
            if mask_gaps:   # re-zero gap/dead lanes so later lane shifts bring zeros
                s = jnp.where(img_mask, s, 0.0)
            outs.append(s)
        return outs

    def avg_pool_to_even(planes):
        # 2x2 mean; valid at the even (y, x) positions ("dilated" storage).
        outs = []
        for p in planes:
            pv = _shift(p, -1, axis=0)     # p[y+1, x]
            ph = _shift(p, -1, axis=1)     # p[y,   x+1]
            pd = _shift(pv, -1, axis=1)    # p[y+1, x+1]
            outs.append((p + pv + ph + pd) * 0.25)
        return outs

    def upsample_from_even(planes):
        # nearest x2: broadcast each even-position value over its 2x2 block.
        outs = []
        for p in planes:
            p0 = jnp.where(even_mask, p, 0.0)
            pv = _shift(p0, 1, axis=0)     # p0[y-1, x]
            ph = _shift(p0, 1, axis=1)     # p0[y,   x-1]
            pd = _shift(pv, 1, axis=1)     # p0[y-1, x-1]
            outs.append(p0 + pv + ph + pd)
        return outs

    # ------------------------------ forward ------------------------------
    x_planes = [x_ref[0, c].astype(f32) for c in range(cin0)]
    y = conv3x3_sigmoid(x_planes, 0, mask_gaps=True)    # conv1 + sig
    y = avg_pool_to_even(y)                             # avgpool(2)   (even grid)
    y = conv3x3_sigmoid(y, 1, mask_gaps=True)           # conv2 + sig  (dilation 2)
    y = conv3x3_sigmoid(y, 2, mask_gaps=False)          # conv3 + sig  (dilation 2)
    y = upsample_from_even(y)                           # upsample x2 (masks gaps itself)
    y = conv3x3_sigmoid(y, 3, mask_gaps=True)           # conv4 + sig
    y = conv3x3_sigmoid(y, 4, mask_gaps=False)          # conv5 + sig (wrapper drops gaps)
    for c in range(cin0):
        o_ref[0, c] = y[c].astype(o_ref.dtype)          # aligned, lane-dense store


def _make_fused_call(G, C_in, H, W, PW, SW, ips, dtype):
    layer_io = ((3, C_in), (3, 3), (3, 3), (3, 3), (C_in, 3))   # (cout, cin)
    dils = (1, 2, 2, 1, 1)
    w_offs, b_offs = [], []
    wo = bo = 0
    for cout, cin in layer_io:
        w_offs.append(wo)
        b_offs.append(bo)
        wo += cout * cin * 9
        bo += cout

    kernel = functools.partial(
        _fused_autoencoder_kernel, cin0=C_in, H=H, W=W, PW=PW, SW=SW, ips=ips,
        layer_io=layer_io, dils=dils, w_offs=tuple(w_offs), b_offs=tuple(b_offs),
        roll_fwd=_ROLL_IS_FWD)

    return pl.pallas_call(
        kernel,
        out_shape=jax.ShapeDtypeStruct((G, C_in, H, PW), dtype),
        grid_spec=pltpu.PrefetchScalarGridSpec(
            num_scalar_prefetch=2,                     # weights + biases -> SMEM
            grid=(G,),                                 # one packed group per step
            in_specs=[pl.BlockSpec((1, C_in, H, PW),
                                   lambda g, w_s, b_s: (g, 0, 0, 0))],
            out_specs=pl.BlockSpec((1, C_in, H, PW),
                                   lambda g, w_s, b_s: (g, 0, 0, 0)),
        ),
        compiler_params=pltpu.CompilerParams(
            dimension_semantics=("parallel",)),        # megacore split (v7x)
    )


def autoencoder_forward(x, params):
    N, C_in, H, W = x.shape
    assert H % 2 == 0 and W % 2 == 0, "spatial dims must be even for avgpool/upsample"
    P = _GAP
    SW = W + 2 * P
    # Lane packing: several images share the same vregs.  For N>=2 keep >=2 grid
    # steps so both v7x TensorCores get work (one TC on v5e/v6e: extra step ~0.35us).
    max_pack = max(1, 128 // SW)
    G = 1 if N < 2 else max(2, pl.cdiv(N, max_pack))
    ips = pl.cdiv(N, G)
    G = pl.cdiv(N, ips)
    PW = ((ips * SW + 127) // 128) * 128               # lane-dense, aligned stores

    # ---- pack: (N,C,H,W) -> (G, C, H, PW) with zero gaps between images ----
    xp = jnp.pad(x, ((0, G * ips - N), (0, 0), (0, 0), (P, P)))
    xp = xp.reshape(G, ips, C_in, H, SW).transpose(0, 2, 3, 1, 4)
    xp = xp.reshape(G, C_in, H, ips * SW)
    if PW > ips * SW:
        xp = jnp.pad(xp, ((0, 0), (0, 0), (0, 0), (0, PW - ips * SW)))

    w_all = jnp.concatenate(
        [params[f"w{i}"].astype(jnp.float32).reshape(-1) for i in range(1, 6)])
    b_all = jnp.concatenate(
        [params[f"b{i}"].astype(jnp.float32).reshape(-1) for i in range(1, 6)])

    out = _make_fused_call(G, C_in, H, W, PW, SW, ips, x.dtype)(w_all, b_all, xp)

    # ---- unpack ----
    out = out[:, :, :, :ips * SW].reshape(G, C_in, H, ips, SW)
    out = out.transpose(0, 3, 1, 2, 4).reshape(G * ips, C_in, H, SW)
    return out[:N, :, :, P:P + W]


# ---------------- parameter init (PyTorch Conv2d default U(-k, k)) ----------------
def init_params(key, in_channel):
    layer_io = [(3, in_channel), (3, 3), (3, 3), (3, 3), (in_channel, 3)]
    params = {}
    for i, (co, ci) in enumerate(layer_io, start=1):
        key, kw, kb = jax.random.split(key, 3)
        bound = 1.0 / (ci * 9) ** 0.5
        params[f"w{i}"] = jax.random.uniform(kw, (co, ci, 3, 3), jnp.float32,
                                             -bound, bound)
        params[f"b{i}"] = jax.random.uniform(kb, (co,), jnp.float32,
                                             -bound, bound)
    return params


# ---------------- pure-JAX reference for validation ----------------
def _ref_conv_sig(x, w, b):
    y = lax.conv_general_dilated(
        x, w, window_strides=(1, 1), padding="SAME",
        dimension_numbers=("NCHW", "OIHW", "NCHW"))
    return jax.nn.sigmoid(y + b[None, :, None, None])


def _ref_avg_pool2(x):
    N, C, H, W = x.shape
    return x.reshape(N, C, H // 2, 2, W // 2, 2).mean(axis=(3, 5))


def _ref_upsample2(x):
    return jnp.repeat(jnp.repeat(x, 2, axis=2), 2, axis=3)


def reference_forward(x, p):
    x = _ref_conv_sig(x, p["w1"], p["b1"])
    x = _ref_avg_pool2(x)
    x = _ref_conv_sig(x, p["w2"], p["b2"])
    x = _ref_conv_sig(x, p["w3"], p["b3"])
    x = _ref_upsample2(x)
    x = _ref_conv_sig(x, p["w4"], p["b4"])
    x = _ref_conv_sig(x, p["w5"], p["b5"])
    return x


if __name__ == "__main__":
    in_channel = 4
    N, H, W = 2, 16, 16

    # Resolve the hardware roll direction once, outside of jit.
    _ROLL_IS_FWD = _probe_roll_convention()

    key = jax.random.PRNGKey(0)
    kx_, kp = jax.random.split(key)
    x = jax.random.uniform(kx_, (N, in_channel, H, W), jnp.float32)
    params = init_params(kp, in_channel)

    out = jax.block_until_ready(jax.jit(autoencoder_forward)(x, params))
    ref = jax.block_until_ready(reference_forward(x, params))
    assert out.shape == (N, in_channel, H, W), out.shape
    err = float(jnp.max(jnp.abs(out - ref)))
    assert jnp.allclose(out, ref, atol=2e-5, rtol=2e-5), err

    print("KERNEL_OK")
</pallas_src>

<mosaic_0001>
module attributes {stable_mosaic.version = 11 : i64} {
  func.func @k(%arg0: memref<8x128xf32, #tpu.memory_space<vmem>>, %arg1: memref<8x128xf32, #tpu.memory_space<vmem>>) attributes {dimension_semantics = [], scalar_prefetch = 0 : i64, scratch_operands = 0 : i64, tpu.core_type = #tpu.core_type<tc>} {
    %c0 = arith.constant 0 : index
    %c0_0 = arith.constant 0 : index
    %0 = vector.load %arg0[%c0, %c0_0] : memref<8x128xf32, #tpu.memory_space<vmem>>, vector<8x128xf32>
    %c1_i32 = arith.constant 1 : i32
    %1 = tpu.dynamic_rotate %0 by %c1_i32 dim 1 : vector<8x128xf32>, i32 -> vector<8x128xf32>
    %c0_1 = arith.constant 0 : index
    %c0_2 = arith.constant 0 : index
    %2 = vector.load %arg1[%c0_1, %c0_2] : memref<8x128xf32, #tpu.memory_space<vmem>>, vector<8x128xf32>
    tpu.vector_store %arg1[%c0_1, %c0_2], %1 {strides = array<i32>} : memref<8x128xf32, #tpu.memory_space<vmem>>, vector<8x128xf32>,
    return
  }
}

</mosaic_0001>

<bundles_post_ra>
// kernel: tpu_custom_call.1
= control target key start
LH: loop header
LB: loop body
LE: loop exit
PB: predicated region body
PF: predicated region fallthrough
CT: control target
= control target key end

     0   :  { %6 = vsyncpa [#allocation3], 0  ;;  %s128_s0 = inlined_call_operand.hbm [shape: f32[8,128], index: 0, kind: input, shape index: {}]   ;;  %s129_s1 = inlined_call_operand.hbm [shape: f32[8,128], index: 1, kind: output, shape index: {}]  }
   0x1   :  { %7 = vsyncpa [#allocation4], 0  ;;  %s91_s6 = smov [#allocation2]   ;;  %s43_s10 = scalar_lea.hbm %s128_s0, 128 }
   0x2   :  { %s14_s7 = sshll.u32 %s91_s6, 4  ;;  %p44_p0 = scmp.ne.s32.totalorder %s128_s0, %s43_s10  ;;  %s15_s7 = int_to_ptr.vmem [resolvable:$true] %s14_s7 }
   0x3   :  { %p47_p1 = scmp.lt.u32.totalorder %s43_s10, %s128_s0 }
   0x5   :  { %p49_p2 = pnand %p47_p1, %p44_p0 }
   0x7   :  { %52 = shalt.err (!%p49_p2)
}
   0x8   :  { %s53_s15 = scalar_lea.vmem %s15_s7, 128  ;;  %p58_p4 = scmp.lt.s32.totalorder %s15_s7, %s15_s7 }
   0x9   :  { %p54_p3 = scmp.ne.s32.totalorder %s15_s7, %s53_s15  ;;  %p59_p5 = scmp.lt.s32.totalorder %s53_s15, %s53_s15 }
   0xb   :  { %p60_p6 = por %p59_p5, %p58_p4 }
   0xd   :  { %p61_p7 = pnand %p60_p6, %p54_p3 }
   0xf   :  { %64 = shalt.err (!%p61_p7)
}
  0x10   :  { %17 = dma.hbm_to_vmem [thread:$0]  %s128_s0, 128, %s15_s7, [#allocation3]  }
  0x11   :  { %87 = dma.done.wait [#allocation3], 128  }
  0x12   :  { %88 = vsyncadd [#allocation3], 4294967168  ;;  %v21_v0 = vld [vmem:[#allocation2] sm:$0xff]  ;;  %s92_s18 = smov 1   ;;  %s93_s19 = smov [#allocation5]  }
  0x13   :  { %22 = vrot.lane.b32.xlu0 %v21_v0, %s92_s18  ;;  %s31_s20 = sshll.u32 %s93_s19, 4  ;;  %s32_s20 = int_to_ptr.vmem [resolvable:$true] %s31_s20 }
  0x14   :  { %s65_s21 = scalar_lea.vmem %s32_s20, 128  ;;  %p70_p9 = scmp.lt.s32.totalorder %s32_s20, %s32_s20 }
  0x15   :  { %p66_p8 = scmp.ne.s32.totalorder %s32_s20, %s65_s21  ;;  %p71_p10 = scmp.lt.s32.totalorder %s65_s21, %s65_s21 }
  0x17   :  { %p72_p11 = por %p71_p10, %p70_p9 }
  0x19   :  { %p73_p12 = pnand %p72_p11, %p66_p8 }
  0x85   :  { %v23_v1 = vpop.permute.xlu0 %22 }
  0x86   :  { %24 = vst [vmem:[#allocation5] sm:$0xff] %v23_v1 }
  0x87   :  { %76 = shalt.err (!%p73_p12)
}
  0x88   :  { %s77_s0 = scalar_lea.hbm %s129_s1, 128 }
  0x89   :  { %p78_p13 = scmp.ne.s32.totalorder %s129_s1, %s77_s0  ;;  %p81_p0 = scmp.lt.u32.totalorder %s77_s0, %s129_s1 }
  0x8b   :  { %p83_p1 = pnand %p81_p0, %p78_p13 }
  0x8d   :  { %86 = shalt.err (!%p83_p1)
}
  0x8e   :  { %34 = dma.vmem_to_hbm [thread:$0]  %s32_s20, 128, %s129_s1, [#allocation4]  }
  0x8f   :  { %89 = dma.done.wait [#allocation4], 128  }
  0x90   :  { %90 = vsyncadd [#allocation4], 4294967168 }
  0x91   :  { %38 = vsyncpa [#allocation3], 1 }
  0x92   :  { %39 = vsyncpa [#allocation4], 1 }

</bundles_post_ra>
